<compile_context>
chip_gen: v7x
topology: tpu7x:2x2x1
jax: 0.10.0
libtpu: 0.0.40
codegen_flags: <defaults>
</compile_context>

<pallas_src>
import functools

import jax
import jax.numpy as jnp
from jax.experimental import pallas as pl
from jax.experimental.pallas import tpu as pltpu


def _round_up(x, m):
    return ((x + m - 1) // m) * m


def _xent_kernel(x_ref, y_ref, out_ref, *, n_classes, s_blk, tiles_per_split,
                 n_pix):
    """One grid step of masked softmax cross-entropy.

    x_ref  : [C, S, 128]  logits (f32 or bf16); pixels dense on (sublane, lane)
    y_ref  : [S, 128]     int32 class index per pixel
    out_ref: [S, 128]     f32 partial sums, resident accumulator across the
                          batch axis and the pixel-tile axis.
    """
    s = pl.program_id(0)   # core split           ("parallel")
    b = pl.program_id(1)   # batch                ("arbitrary", accumulated)
    i = pl.program_id(2)   # pixel tile in split  ("arbitrary", accumulated)

    @pl.when((b == 0) & (i == 0))
    def _():
        out_ref[...] = jnp.zeros_like(out_ref)

    # Unclamped tile index.  The index_map clamps to the last real tile; the
    # pixel-index mask below zeroes duplicated / out-of-range / padded work.
    blk = s * tiles_per_split + i
    row = jax.lax.broadcasted_iota(jnp.int32, (s_blk, 128), 0)
    lane = jax.lax.broadcasted_iota(jnp.int32, (s_blk, 128), 1)
    pix = (blk * s_blk + row) * 128 + lane
    valid = pix < n_pix

    labels = y_ref[...]                                           # [S, 128]

    def plane(c):
        # autocast: the wrapped criterion sees half-precision (bf16) inputs;
        # softmax / log / accumulation stay in float32.
        return x_ref[c].astype(jnp.bfloat16).astype(jnp.float32)  # [S, 128]

    # Pass 1: running max over classes — elementwise across C dense planes.
    m = plane(0)
    for c in range(1, n_classes):
        m = jnp.maximum(m, plane(c))

    # Pass 2: sum(exp) and the shifted logit at the label, again elementwise.
    sum_exp = jnp.zeros((s_blk, 128), jnp.float32)
    z_at_label = jnp.zeros((s_blk, 128), jnp.float32)
    for c in range(n_classes):
        z = plane(c) - m
        sum_exp = sum_exp + jnp.exp(z)
        z_at_label = z_at_label + jnp.where(labels == c, z, 0.0)
    # NOTE: labels outside [0, C) silently contribute lse (PyTorch would error).

    loss = jnp.log(sum_exp) - z_at_label                          # [S, 128]
    out_ref[...] += jnp.where(valid, loss, 0.0)


def criterion_with_autocast(logits_nchw, labels_bhw, *, num_cores=None,
                            vmem_block_budget=16 * 1024 * 1024):
    """Forward pass of CriterionWithAutocast(softmax-cross-entropy criterion).

    logits_nchw: float32 [B, C, H, W]
    labels_bhw : int32   [B, H, W]   (class indices in [0, C))
    num_cores  : optional TensorCore count per chip (2 on v7x) to control the
                 parallel pixel split; None -> portable heuristic.
    returns    : float32 scalar mean cross-entropy
    """
    B, C, H, W = logits_nchw.shape
    HW = H * W
    N = B * HW

    hw_pad = _round_up(HW, 128)
    s_total = hw_pad // 128

    x = logits_nchw.reshape(B, C, HW)                 # free row-major reshape
    y = labels_bhw.reshape(B, HW).astype(jnp.int32)
    if hw_pad != HW:
        # Ragged tail (< 128 pixels): pad to the next lane row.  This pass is
        # a copy, so fold the autocast bf16 cast into it (halves both the copy
        # and the kernel's HBM read).  Padded pixels are masked in-kernel by
        # the pixel-index test, so any label value is fine.
        # TODO(synk): when jitted with the model, emit bf16 / 128-aligned
        # logits upstream so this copy (and the f32 round trip on the aligned
        # path) disappears entirely.
        x = jnp.pad(x.astype(jnp.bfloat16), ((0, 0), (0, 0), (0, hw_pad - HW)))
        y = jnp.pad(y, ((0, 0), (0, hw_pad - HW)))
    x = x.reshape(B, C, s_total, 128)                 # free, row-major
    y = y.reshape(B, s_total, 128)

    # Tile rows of 128 pixels, sized from a VMEM budget (double-buffered
    # logits + labels + resident output), not from a fixed pixel cap.
    dtype_bytes = x.dtype.itemsize
    per_row_bytes = 128 * (C * dtype_bytes * 2 + 4 * 2 + 4 * 2)
    s_blk = max(8, min(2048, vmem_block_budget // per_row_bytes) // 8 * 8)
    if s_total >= 16:
        # Leave room for a 2-way core split when there is enough work.
        s_blk = min(s_blk, _round_up(pl.cdiv(s_total, 2), 8))
    if s_blk >= s_total:
        s_blk = s_total

    n_blocks = pl.cdiv(s_total, s_blk)

    # 2-way pixel split feeds both TensorCores on multi-core chips (v7x).  On
    # single-core chips it is harmless when the block count splits evenly
    # (clamped index_map + in-kernel mask => no padded reads, tiny extra
    # partial output), so only take it in that case unless told otherwise.
    if num_cores == 1 or n_blocks < 2:
        n_splits = 1
    elif num_cores is not None and num_cores >= 2:
        n_splits = 2
    else:
        n_splits = 2 if (n_blocks % 2 == 0 or n_blocks >= 16) else 1
    tiles_per_split = pl.cdiv(n_blocks, n_splits)

    def _logits_map(s, b, i):
        blk = jnp.minimum(s * tiles_per_split + i, n_blocks - 1)
        return (b, 0, blk, 0)

    def _labels_map(s, b, i):
        blk = jnp.minimum(s * tiles_per_split + i, n_blocks - 1)
        return (b, blk, 0)

    kernel = functools.partial(
        _xent_kernel, n_classes=C, s_blk=s_blk,
        tiles_per_split=tiles_per_split, n_pix=HW)

    partial = pl.pallas_call(
        kernel,
        out_shape=jax.ShapeDtypeStruct((n_splits, s_blk, 128), jnp.float32),
        grid=(n_splits, B, tiles_per_split),
        in_specs=[
            pl.BlockSpec((None, C, s_blk, 128), _logits_map),
            pl.BlockSpec((None, s_blk, 128), _labels_map),
        ],
        out_specs=pl.BlockSpec((None, s_blk, 128), lambda s, b, i: (s, 0, 0)),
        compiler_params=pltpu.CompilerParams(
            dimension_semantics=("parallel", "arbitrary", "arbitrary"),
            vmem_limit_bytes=32 * 1024 * 1024,
        ),
    )(x, y)

    # Tiny final reduce + normalization by the true pixel count.
    return jnp.sum(partial) / jnp.float32(N)


def _reference(logits_nchw, labels_bhw):
    """Pure-JAX reference mirroring the autocast criterion."""
    B, C, H, W = logits_nchw.shape
    x = logits_nchw.astype(jnp.bfloat16).astype(jnp.float32)
    x = jnp.transpose(x, (0, 2, 3, 1)).reshape(-1, C)
    y = jax.nn.one_hot(labels_bhw.reshape(-1), C, dtype=jnp.float32)
    logp = jax.nn.log_softmax(x, axis=-1)
    return -jnp.mean(jnp.sum(y * logp, axis=-1))


if __name__ == "__main__":
    key = jax.random.PRNGKey(0)
    k_logits, k_labels = jax.random.split(key)

    # Main check: shapes consistent with the module (B=2, C=4, 16x16 spatial).
    B, C, H, W = 2, 4, 16, 16
    logits = jax.random.normal(k_logits, (B, C, H, W), dtype=jnp.float32)
    labels = jax.random.randint(k_labels, (B, H, W), 0, C, dtype=jnp.int32)

    loss = criterion_with_autocast(logits, labels)
    loss = jax.block_until_ready(loss)
    ref = _reference(logits, labels)
    assert jnp.allclose(loss, ref, rtol=1e-2, atol=1e-2), (loss, ref)

    # Ragged pixel count (exercises the padded / masked tail path).
    B2, C2, H2, W2 = 1, 3, 10, 12
    logits2 = jax.random.normal(k_logits, (B2, C2, H2, W2), dtype=jnp.float32)
    labels2 = jax.random.randint(k_labels, (B2, H2, W2), 0, C2, dtype=jnp.int32)
    loss2 = jax.block_until_ready(criterion_with_autocast(logits2, labels2))
    ref2 = _reference(logits2, labels2)
    assert jnp.allclose(loss2, ref2, rtol=1e-2, atol=1e-2), (loss2, ref2)

    # Larger, 128-aligned case with multiple pixel tiles + 2-way split path.
    B3, C3, H3, W3 = 2, 4, 64, 64
    logits3 = jax.random.normal(k_logits, (B3, C3, H3, W3), dtype=jnp.float32)
    labels3 = jax.random.randint(k_labels, (B3, H3, W3), 0, C3, dtype=jnp.int32)
    loss3 = jax.block_until_ready(
        criterion_with_autocast(logits3, labels3, vmem_block_budget=64 * 1024))
    ref3 = _reference(logits3, labels3)
    assert jnp.allclose(loss3, ref3, rtol=1e-2, atol=1e-2), (loss3, ref3)

    print("KERNEL_OK")
</pallas_src>

<mosaic_0001>
module attributes {stable_mosaic.version = 11 : i64} {
  func.func @_xent_kernel(%arg0: i32, %arg1: i32, %arg2: i32, %arg3: memref<1x4x2x128xf32, #tpu.memory_space<vmem>>, %arg4: memref<1x2x128xi32, #tpu.memory_space<vmem>>, %arg5: memref<1x2x128xf32, #tpu.memory_space<vmem>>) attributes {dimension_semantics = [#tpu.dimension_semantics<parallel>, #tpu.dimension_semantics<arbitrary>, #tpu.dimension_semantics<arbitrary>], iteration_bounds = array<i64: 1, 2, 1>, scalar_prefetch = 0 : i64, scratch_operands = 0 : i64, tpu.core_type = #tpu.core_type<tc>, window_params = [{transform_indices = @transform_0, window_bounds = array<i64: 1, 4, 2, 128>}, {transform_indices = @transform_1, window_bounds = array<i64: 1, 2, 128>}, {transform_indices = @transform_2, window_bounds = array<i64: 1, 2, 128>}]} {
    %c0_i32 = arith.constant 0 : i32
    %0 = arith.cmpi eq, %arg1, %c0_i32 : i32
    %c0_i32_0 = arith.constant 0 : i32
    %1 = arith.cmpi eq, %arg2, %c0_i32_0 : i32
    %2 = arith.andi %0, %1 : i1
    %3 = arith.extui %2 : i1 to i32
    %c0_i32_1 = arith.constant 0 : i32
    %4 = arith.cmpi ne, %3, %c0_i32_1 : i32
    scf.if %4 {
      %cst_48 = arith.constant 0.000000e+00 : f32
      %98 = vector.broadcast %cst_48 : f32 to vector<2x128xf32>
      %c0_49 = arith.constant 0 : index
      %c0_50 = arith.constant 0 : index
      %c0_51 = arith.constant 0 : index
      %99 = vector.load %arg5[%c0_49, %c0_50, %c0_51] : memref<1x2x128xf32, #tpu.memory_space<vmem>>, vector<1x2x128xf32>
      %100 = vector.shape_cast %99 : vector<1x2x128xf32> to vector<2x128xf32>
      %101 = vector.shape_cast %98 : vector<2x128xf32> to vector<1x2x128xf32>
      tpu.vector_store %arg5[%c0_49, %c0_50, %c0_51], %101 {strides = array<i32>} : memref<1x2x128xf32, #tpu.memory_space<vmem>>, vector<1x2x128xf32>,
    } else {
    }
    %c1_i32 = arith.constant 1 : i32
    %5 = arith.muli %arg0, %c1_i32 : i32
    %6 = arith.addi %5, %arg2 : i32
    %7 = tpu.iota {dimensions = array<i32: 0>} : vector<2x128xi32>
    %8 = tpu.iota {dimensions = array<i32: 1>} : vector<2x128xi32>
    %c2_i32 = arith.constant 2 : i32
    %9 = arith.muli %6, %c2_i32 : i32
    %10 = vector.broadcast %9 : i32 to vector<2x128xi32>
    %11 = arith.addi %10, %7 : vector<2x128xi32>
    %c128_i32 = arith.constant 128 : i32
    %12 = vector.broadcast %c128_i32 : i32 to vector<2x128xi32>
    %13 = arith.muli %11, %12 : vector<2x128xi32>
    %14 = arith.addi %13, %8 : vector<2x128xi32>
    %c256_i32 = arith.constant 256 : i32
    %15 = vector.broadcast %c256_i32 : i32 to vector<2x128xi32>
    %16 = arith.cmpi slt, %14, %15 : vector<2x128xi32>
    %c0 = arith.constant 0 : index
    %c0_2 = arith.constant 0 : index
    %c0_3 = arith.constant 0 : index
    %17 = vector.load %arg4[%c0, %c0_2, %c0_3] : memref<1x2x128xi32, #tpu.memory_space<vmem>>, vector<1x2x128xi32>
    %18 = vector.shape_cast %17 : vector<1x2x128xi32> to vector<2x128xi32>
    %c0_4 = arith.constant 0 : index
    %c0_5 = arith.constant 0 : index
    %c0_6 = arith.constant 0 : index
    %c0_7 = arith.constant 0 : index
    %19 = vector.load %arg3[%c0_4, %c0_5, %c0_6, %c0_7] : memref<1x4x2x128xf32, #tpu.memory_space<vmem>>, vector<1x1x2x128xf32>
    %20 = vector.shape_cast %19 : vector<1x1x2x128xf32> to vector<2x128xf32>
    %21 = arith.truncf %20 : vector<2x128xf32> to vector<2x128xbf16>
    %22 = arith.extf %21 : vector<2x128xbf16> to vector<2x128xf32>
    %c0_8 = arith.constant 0 : index
    %c1 = arith.constant 1 : index
    %c0_9 = arith.constant 0 : index
    %c0_10 = arith.constant 0 : index
    %23 = vector.load %arg3[%c0_8, %c1, %c0_9, %c0_10] : memref<1x4x2x128xf32, #tpu.memory_space<vmem>>, vector<1x1x2x128xf32>
    %24 = vector.shape_cast %23 : vector<1x1x2x128xf32> to vector<2x128xf32>
    %25 = arith.truncf %24 : vector<2x128xf32> to vector<2x128xbf16>
    %26 = arith.extf %25 : vector<2x128xbf16> to vector<2x128xf32>
    %27 = arith.maximumf %22, %26 : vector<2x128xf32>
    %c0_11 = arith.constant 0 : index
    %c2 = arith.constant 2 : index
    %c0_12 = arith.constant 0 : index
    %c0_13 = arith.constant 0 : index
    %28 = vector.load %arg3[%c0_11, %c2, %c0_12, %c0_13] : memref<1x4x2x128xf32, #tpu.memory_space<vmem>>, vector<1x1x2x128xf32>
    %29 = vector.shape_cast %28 : vector<1x1x2x128xf32> to vector<2x128xf32>
    %30 = arith.truncf %29 : vector<2x128xf32> to vector<2x128xbf16>
    %31 = arith.extf %30 : vector<2x128xbf16> to vector<2x128xf32>
    %32 = arith.maximumf %27, %31 : vector<2x128xf32>
    %c0_14 = arith.constant 0 : index
    %c3 = arith.constant 3 : index
    %c0_15 = arith.constant 0 : index
    %c0_16 = arith.constant 0 : index
    %33 = vector.load %arg3[%c0_14, %c3, %c0_15, %c0_16] : memref<1x4x2x128xf32, #tpu.memory_space<vmem>>, vector<1x1x2x128xf32>
    %34 = vector.shape_cast %33 : vector<1x1x2x128xf32> to vector<2x128xf32>
    %35 = arith.truncf %34 : vector<2x128xf32> to vector<2x128xbf16>
    %36 = arith.extf %35 : vector<2x128xbf16> to vector<2x128xf32>
    %37 = arith.maximumf %32, %36 : vector<2x128xf32>
    %cst = arith.constant 0.000000e+00 : f32
    %38 = vector.broadcast %cst : f32 to vector<2x128xf32>
    %cst_17 = arith.constant 0.000000e+00 : f32
    %39 = vector.broadcast %cst_17 : f32 to vector<2x128xf32>
    %c0_18 = arith.constant 0 : index
    %c0_19 = arith.constant 0 : index
    %c0_20 = arith.constant 0 : index
    %c0_21 = arith.constant 0 : index
    %40 = vector.load %arg3[%c0_18, %c0_19, %c0_20, %c0_21] : memref<1x4x2x128xf32, #tpu.memory_space<vmem>>, vector<1x1x2x128xf32>
    %41 = vector.shape_cast %40 : vector<1x1x2x128xf32> to vector<2x128xf32>
    %42 = arith.truncf %41 : vector<2x128xf32> to vector<2x128xbf16>
    %43 = arith.extf %42 : vector<2x128xbf16> to vector<2x128xf32>
    %44 = arith.subf %43, %37 : vector<2x128xf32>
    %45 = math.exp %44 : vector<2x128xf32>
    %46 = arith.addf %38, %45 : vector<2x128xf32>
    %c0_i32_22 = arith.constant 0 : i32
    %47 = vector.broadcast %c0_i32_22 : i32 to vector<2x128xi32>
    %48 = arith.cmpi eq, %18, %47 : vector<2x128xi32>
    %cst_23 = arith.constant 0.000000e+00 : f32
    %49 = vector.broadcast %cst_23 : f32 to vector<2x128xf32>
    %50 = arith.select %48, %44, %49 : vector<2x128xi1>, vector<2x128xf32>
    %51 = arith.addf %39, %50 : vector<2x128xf32>
    %c0_24 = arith.constant 0 : index
    %c1_25 = arith.constant 1 : index
    %c0_26 = arith.constant 0 : index
    %c0_27 = arith.constant 0 : index
    %52 = vector.load %arg3[%c0_24, %c1_25, %c0_26, %c0_27] : memref<1x4x2x128xf32, #tpu.memory_space<vmem>>, vector<1x1x2x128xf32>
    %53 = vector.shape_cast %52 : vector<1x1x2x128xf32> to vector<2x128xf32>
    %54 = arith.truncf %53 : vector<2x128xf32> to vector<2x128xbf16>
    %55 = arith.extf %54 : vector<2x128xbf16> to vector<2x128xf32>
    %56 = arith.subf %55, %37 : vector<2x128xf32>
    %57 = math.exp %56 : vector<2x128xf32>
    %58 = arith.addf %46, %57 : vector<2x128xf32>
    %c1_i32_28 = arith.constant 1 : i32
    %59 = vector.broadcast %c1_i32_28 : i32 to vector<2x128xi32>
    %60 = arith.cmpi eq, %18, %59 : vector<2x128xi32>
    %cst_29 = arith.constant 0.000000e+00 : f32
    %61 = vector.broadcast %cst_29 : f32 to vector<2x128xf32>
    %62 = arith.select %60, %56, %61 : vector<2x128xi1>, vector<2x128xf32>
    %63 = arith.addf %51, %62 : vector<2x128xf32>
    %c0_30 = arith.constant 0 : index
    %c2_31 = arith.constant 2 : index
    %c0_32 = arith.constant 0 : index
    %c0_33 = arith.constant 0 : index
    %64 = vector.load %arg3[%c0_30, %c2_31, %c0_32, %c0_33] : memref<1x4x2x128xf32, #tpu.memory_space<vmem>>, vector<1x1x2x128xf32>
    %65 = vector.shape_cast %64 : vector<1x1x2x128xf32> to vector<2x128xf32>
    %66 = arith.truncf %65 : vector<2x128xf32> to vector<2x128xbf16>
    %67 = arith.extf %66 : vector<2x128xbf16> to vector<2x128xf32>
    %68 = arith.subf %67, %37 : vector<2x128xf32>
    %69 = math.exp %68 : vector<2x128xf32>
    %70 = arith.addf %58, %69 : vector<2x128xf32>
    %c2_i32_34 = arith.constant 2 : i32
    %71 = vector.broadcast %c2_i32_34 : i32 to vector<2x128xi32>
    %72 = arith.cmpi eq, %18, %71 : vector<2x128xi32>
    %cst_35 = arith.constant 0.000000e+00 : f32
    %73 = vector.broadcast %cst_35 : f32 to vector<2x128xf32>
    %74 = arith.select %72, %68, %73 : vector<2x128xi1>, vector<2x128xf32>
    %75 = arith.addf %63, %74 : vector<2x128xf32>
    %c0_36 = arith.constant 0 : index
    %c3_37 = arith.constant 3 : index
    %c0_38 = arith.constant 0 : index
    %c0_39 = arith.constant 0 : index
    %76 = vector.load %arg3[%c0_36, %c3_37, %c0_38, %c0_39] : memref<1x4x2x128xf32, #tpu.memory_space<vmem>>, vector<1x1x2x128xf32>
    %77 = vector.shape_cast %76 : vector<1x1x2x128xf32> to vector<2x128xf32>
    %78 = arith.truncf %77 : vector<2x128xf32> to vector<2x128xbf16>
    %79 = arith.extf %78 : vector<2x128xbf16> to vector<2x128xf32>
    %80 = arith.subf %79, %37 : vector<2x128xf32>
    %81 = math.exp %80 : vector<2x128xf32>
    %82 = arith.addf %70, %81 : vector<2x128xf32>
    %c3_i32 = arith.constant 3 : i32
    %83 = vector.broadcast %c3_i32 : i32 to vector<2x128xi32>
    %84 = arith.cmpi eq, %18, %83 : vector<2x128xi32>
    %cst_40 = arith.constant 0.000000e+00 : f32
    %85 = vector.broadcast %cst_40 : f32 to vector<2x128xf32>
    %86 = arith.select %84, %80, %85 : vector<2x128xi1>, vector<2x128xf32>
    %87 = arith.addf %75, %86 : vector<2x128xf32>
    %88 = math.log %82 : vector<2x128xf32>
    %89 = arith.subf %88, %87 : vector<2x128xf32>
    %c0_41 = arith.constant 0 : index
    %c0_42 = arith.constant 0 : index
    %c0_43 = arith.constant 0 : index
    %90 = vector.load %arg5[%c0_41, %c0_42, %c0_43] : memref<1x2x128xf32, #tpu.memory_space<vmem>>, vector<1x2x128xf32>
    %91 = vector.shape_cast %90 : vector<1x2x128xf32> to vector<2x128xf32>
    %cst_44 = arith.constant 0.000000e+00 : f32
    %92 = vector.broadcast %cst_44 : f32 to vector<2x128xf32>
    %93 = arith.select %16, %89, %92 : vector<2x128xi1>, vector<2x128xf32>
    %94 = arith.addf %91, %93 : vector<2x128xf32>
    %c0_45 = arith.constant 0 : index
    %c0_46 = arith.constant 0 : index
    %c0_47 = arith.constant 0 : index
    %95 = vector.load %arg5[%c0_45, %c0_46, %c0_47] : memref<1x2x128xf32, #tpu.memory_space<vmem>>, vector<1x2x128xf32>
    %96 = vector.shape_cast %95 : vector<1x2x128xf32> to vector<2x128xf32>
    %97 = vector.shape_cast %94 : vector<2x128xf32> to vector<1x2x128xf32>
    tpu.vector_store %arg5[%c0_45, %c0_46, %c0_47], %97 {strides = array<i32>} : memref<1x2x128xf32, #tpu.memory_space<vmem>>, vector<1x2x128xf32>,
    return
  }
  func.func @transform_0(%arg0: i32, %arg1: i32, %arg2: i32) -> (i32, i32, i32, i32) {
    %c1_i32 = arith.constant 1 : i32
    %0 = arith.muli %arg0, %c1_i32 : i32
    %1 = arith.addi %0, %arg2 : i32
    %c0_i32 = arith.constant 0 : i32
    %2 = arith.minsi %1, %c0_i32 : i32
    %c0_i32_0 = arith.constant 0 : i32
    %c0_i32_1 = arith.constant 0 : i32
    %c0_i32_2 = arith.constant 0 : i32
    return %arg1, %c0_i32_0, %2, %c0_i32_1 : i32, i32, i32, i32
  }
  func.func @transform_1(%arg0: i32, %arg1: i32, %arg2: i32) -> (i32, i32, i32) {
    %c1_i32 = arith.constant 1 : i32
    %0 = arith.muli %arg0, %c1_i32 : i32
    %1 = arith.addi %0, %arg2 : i32
    %c0_i32 = arith.constant 0 : i32
    %2 = arith.minsi %1, %c0_i32 : i32
    %c0_i32_0 = arith.constant 0 : i32
    %c0_i32_1 = arith.constant 0 : i32
    return %arg1, %2, %c0_i32_0 : i32, i32, i32
  }
  func.func @transform_2(%arg0: i32, %arg1: i32, %arg2: i32) -> (i32, i32, i32) {
    %c0_i32 = arith.constant 0 : i32
    %c0_i32_0 = arith.constant 0 : i32
    %c0_i32_1 = arith.constant 0 : i32
    return %arg0, %c0_i32, %c0_i32_0 : i32, i32, i32
  }
}

</mosaic_0001>

<bundles_post_ra>
// kernel: tpu_custom_call.1
= control target key start
LH: loop header
LB: loop body
LE: loop exit
PB: predicated region body
PF: predicated region fallthrough
CT: control target
= control target key end

     0   :  { %7 = vsyncpa [#allocation3], 0  ;;  %s873_s0 = inlined_call_operand.hbm [shape: f32[2,4,2,128], index: 0, kind: input, shape index: {}]   ;;  %s874_s1 = inlined_call_operand.hbm [shape: s32[2,2,128], index: 1, kind: input, shape index: {}]   ;;  %s875_s2 = inlined_call_operand.hbm [shape: f32[1,2,128], index: 2, kind: output, shape index: {}]  }
   0x1   :  { %9 = vsyncpa [#allocation3 + $0x1], 0 }
   0x2   :  { %10 = vsyncpa [#allocation6], 0 }
   0x3   :  { %12 = vsyncpa [#allocation6 + $0x1], 0 }
   0x4   :  { %13 = vsyncpa [#allocation4], 0  ;;  %s680_s9 = smov 0   ;;  %s682_s10 = smov 0  }
   0x5   :  { %s684_s11 = smov 0   ;;  %s686_s12 = smov 0  }
   0x6   :  { %s688_s13 = smov 0   ;;  %s690_s14 = smov 0  }
   0x7 LB: > { %s412_s15 = sadd.s32 4294967295, %s657_s14   ;;  %s34_s16 = sadd.s32 1, %s653_s13  ;;  %s657_s14 = sphi %s690_s14, %s19_s14   ;;  %s653_s13 = sphi %s688_s13, %s888_s13   ;;  %s649_s12 = sphi %s686_s12, %s887_s12   ;;  %s645_s11 = sphi %s684_s11, %s886_s11   ;;  %s641_s10 = sphi %s682_s10, %s885_s10   ;;  %s637_s9 = sphi %s680_s9, %s884_s9  }
   0x8   : > { %p36_p0 = scmp.ge.s32.totalorder %s34_s16, 2  ;;  %s53_s17 = sadd.s32 1, %s645_s11 }
   0x9   : > { %p60_p1 = scmp.ne.s32.totalorder %s645_s11, %s641_s10  ;;  %p61_p2 = scmp.eq.s32.totalorder %s657_s14, 0 }
   0xa   : > { %s890_s16 = smov (%p36_p0, %s34_s16), 0  ;;  %p66_p4 = scmp.ne.s32.totalorder %s641_s10, %s637_s9 }
   0xb   : > { %p716_p3 = por %p61_p2, %p60_p1  ;;  %s48_s19 = ssub.s32 %s653_s13, %s890_s16 }
   0xc   : > { %p67_p5 = scmp.eq.s32.totalorder %s412_s15, 0  ;;  %p51_p6 = scmp.eq.s32.totalorder %s48_s19, 0 }
   0xd   : > { %p448_p8 = scmp.lt.s32.totalorder %s657_s14, 2  ;;  %s734_s22 = sand.u32 1, %s645_s11  }
   0xe   : > { %p725_p7 = por %p67_p5, %p66_p4  ;;  %s431_s23 = sshll.u32 %s653_s13, 7 }
   0xf   : > { %s731_s21 = scalar_select %p51_p6, %s645_s11, %s53_s17  }
  0x10   : > { %s878_s20 = scalar_select %p725_p7, 1, 0 }
  0x11   : > { %s415_s24 = sshll.u32 %s734_s22, 3  ;;  %s741_s27 = scalar_lea.hbm %s873_s0, %s431_s23 }
  0x12   : > { %s154_s28 = scalar_lea.vmem [#allocation2], %s415_s24  ;;  %p745_p9 = pnand %p448_p8, %p716_p3 }
  0x13   : > { %s165_s29 = sshll.u32 %s154_s28, 4  ;;  %s151_s3 = scalar_lea.sflag [#allocation3], %s734_s22  ;;  %s749_s29 = int_to_ptr.vmem [resolvable:$true] %s165_s29 }
  0x14   : > { %s513_s4 = scalar_lea.hbm %s741_s27, 128  ;;  %p515_p11 = pneg %p745_p9 }
  0x15   : > { %p514_p10 = scmp.ne.s32.totalorder %s741_s27, %s513_s4  ;;  %s518_s7 = scalar_lea.hbm %s873_s0, 256 }
  0x16   : > { %p519_p0 = scmp.lt.u32.totalorder %s741_s27, %s873_s0  ;;  %p520_p1 = scmp.lt.u32.totalorder %s518_s7, %s513_s4 }
  0x17   : > { %p516_p12 = pnand %p515_p11, %p514_p10  ;;  %p522_p3 = scmp.lt.u32.totalorder %s513_s4, %s741_s27 }
  0x18   : > { %p521_p2 = por %p520_p1, %p519_p0 }
  0x19   : > { %p517_p13 = pneg %p516_p12 }
  0x1a   : > { %p523_p4 = por %p522_p3, %p521_p2 }
  0x1c   : > { %p524_p5 = pnand %p523_p4, %p517_p13 }
  0x1e   : > { %527 = shalt.err (!%p524_p5)
}
  0x1f   : > { %s528_s17 = scalar_lea.vmem %s749_s29, 128  ;;  %s659_s18 = smov [#allocation2]  }
  0x20   : > { %p529_p6 = scmp.ne.s32.totalorder %s749_s29, %s528_s17  ;;  %s533_s19 = sshll.u32 %s659_s18, 4  ;;  %s534_s19 = int_to_ptr.vmem [resolvable:$false] %s533_s19 }
  0x21   : > { %s535_s23 = scalar_lea.vmem %s534_s19, 256  ;;  %p536_p12 = scmp.lt.s32.totalorder %s749_s29, %s534_s19 }
  0x22   : > { %p531_p8 = pnand %p529_p6, %p515_p11  ;;  %p537_p0 = scmp.lt.s32.totalorder %s535_s23, %s528_s17 }
  0x24   : > { %p532_p10 = pneg %p531_p8  ;;  %p538_p1 = por %p537_p0, %p536_p12 }
  0x26   : > { %p539_p2 = pnand %p538_p1, %p532_p10 }
  0x28   : > { %542 = shalt.err (!%p539_p2)
}
  0x29   : > { %s660_s24 = smov 32   ;;  %s661_s25 = smov 2  }
  0x2a   : > { %444 = dma.hbm_to_vmem [thread:$0]  (!%p745_p9), %s741_s27, 128, %s749_s29, %s151_s3, %s660_s24, %s660_s24, %s661_s25  }
  0x2b   : > { %p420_p13 = scmp.ge.s32.totalorder %s657_s14, 1  ;;  %p195_p3 = scmp.lt.s32.totalorder %s657_s14, 3 }
  0x2c   : > { %s418_s26 = sshll.u32 %s734_s22, 1  ;;  %s419_s4 = sshll.u32 %s653_s13, 5 }
  0x2d   : > { %p782_p4 = pnand %p420_p13, %p195_p3  ;;  %s179_s5 = scalar_lea.vmem [#allocation5], %s418_s26 }
  0x2e   : > { %s190_s6 = sshll.u32 %s179_s5, 4  ;;  %s790_s9 = scalar_lea.hbm %s874_s1, %s419_s4  ;;  %s191_s6 = int_to_ptr.vmem [resolvable:$true] %s190_s6 }
  0x2f   : > { %s880_s28 = scalar_select %p782_p4, 1, 0 }
  0x30   : > { %s176_s27 = scalar_lea.sflag [#allocation6], %s734_s22  ;;  %s543_s29 = scalar_lea.hbm %s790_s9, 32 }
  0x31   : > { %p544_p5 = scmp.ne.s32.totalorder %s790_s9, %s543_s29  ;;  %s548_s18 = scalar_lea.hbm %s874_s1, 64 }
  0x32   : > { %p549_p10 = scmp.lt.u32.totalorder %s790_s9, %s874_s1  ;;  %p550_p12 = scmp.lt.u32.totalorder %s548_s18, %s543_s29 }
  0x33   : > { %p546_p6 = pnand %p544_p5, %p515_p11  ;;  %p552_p1 = scmp.lt.u32.totalorder %s543_s29, %s790_s9 }
  0x34   : > { %p551_p0 = por %p550_p12, %p549_p10 }
  0x35   : > { %p547_p8 = pneg %p546_p6 }
  0x36   : > { %p553_p2 = por %p552_p1, %p551_p0 }
  0x38   : > { %p554_p13 = pnand %p553_p2, %p547_p8 }
  0x3a   : > { %557 = shalt.err (!%p554_p13)
}
  0x3b   : > { %s558_s22 = scalar_lea.vmem %s191_s6, 32  ;;  %s662_s24 = smov [#allocation5]  }
  0x3c   : > { %p559_p3 = scmp.ne.s32.totalorder %s191_s6, %s558_s22  ;;  %s563_s25 = sshll.u32 %s662_s24, 4  ;;  %s564_s25 = int_to_ptr.vmem [resolvable:$false] %s563_s25 }
  0x3d   : > { %s565_s26 = scalar_lea.vmem %s564_s25, 64  ;;  %p566_p7 = scmp.lt.s32.totalorder %s191_s6, %s564_s25 }
  0x3e   : > { %p561_p5 = pnand %p559_p3, %p515_p11  ;;  %p567_p4 = scmp.lt.s32.totalorder %s565_s26, %s558_s22 }
  0x40   : > { %p562_p6 = pneg %p561_p5  ;;  %p568_p10 = por %p567_p4, %p566_p7 }
  0x42   : > { %p569_p12 = pnand %p568_p10, %p562_p6 }
  0x44   : > { %572 = shalt.err (!%p569_p12)
}
  0x45   : > { %447 = dma.hbm_to_vmem [thread:$0]  (!%p745_p9), %s790_s9, 32, %s191_s6, %s176_s27  }
  0x46   : > { %p881_p8 = scmp.ne.s32.totalorder %s880_s28, 0 }
  0x47   : > { %s201_s4 = sand.u32 (!%p881_p8), 1, %s641_s10   ;;  %p882_p11 = scmp.ne.s32.totalorder (!%p881_p8), %s878_s20, 0 }
  0x48   : > { %199 = sbr.rel (%p881_p8) target bundleno = 158 (0x9e), region = 28  ;;  %s421_s5 = sshll.u32 (!%p881_p8), %s201_s4, 3 }
  0x49   : > { %s202_s7 = scalar_lea.sflag (!%p881_p8), [#allocation3], %s201_s4  ;;  %s205_s8 = scalar_lea.vmem (!%p881_p8), [#allocation2], %s421_s5 }
  0x4f   : > { %624 = dma.done.wait (%p882_p11), %s202_s7, 128  }
  0x50   : > { %626 = vsyncadd (%p882_p11), %s202_s7, 4294967168  ;;  %s422_s29 = sshll.u32 %s201_s4, 1  ;;  %s211_s3 = scalar_lea.sflag [#allocation6], %s201_s4 }
  0x51   : > { %s819_s30 = scalar_lea.vmem [#allocation5], %s422_s29 }
  0x52   : > { %628 = dma.done.wait (%p882_p11), %s211_s3, 32  }
  0x53   : > { %630 = vsyncadd (%p882_p11), %s211_s3, 4294967264  ;;  %p241_p7 = scmp.eq.s32.totalorder %s649_s12, 0 }
  0x54   : > { %v663_v0 = vmov (%p241_p7), 0.0  }
  0x55   : > { %246 = sbr.rel (!%p241_p7) target bundleno = 92 (0x5c), region = 40  ;;  %247 = vst [vmem:[#allocation7] sm:$0x3] (%p241_p7), %v663_v0 }
  0x5c PF: > { %v260_v1 = vld [vmem:[%s205_s8] sm:$0x3]  ;;  %v424_v2 = vld [vmem:[%s205_s8 + $0x2] sm:$0x3]  ;;  %v425_v5 = vld [vmem:[%s205_s8 + $0x4] sm:$0x3]  ;;  %v249_v30 = vlaneseq }
  0x5d   : > { %v261_v3 = vpack.c.bf16 %v260_v1, %v260_v1  ;;  %v265_v4 = vpack.c.bf16 %v424_v2, %v424_v2  ;;  %v426_v6 = vld [vmem:[%s205_s8 + $0x6] sm:$0x3]  ;;  %v270_v7 = vpack.c.bf16 %v425_v5, %v425_v5  ;;  %v259_v25 = vld [vmem:[%s819_s30] sm:$0x3]  ;;  %v309_v47 = vld [vmem:[#allocation7] sm:$0x3] }
  0x5e   : > { %v275_v8 = vpack.c.bf16 %v426_v6, %v426_v6  ;;  %vm282_vm0 = vcmp.eq.s32.totalorder %v259_v25, 0  ;;  %vm289_vm1 = vcmp.eq.s32.totalorder %v259_v25, 1  ;;  %vm296_vm2 = vcmp.eq.s32.totalorder %v259_v25, 2  ;;  %s664_s12 = smov [#allocation7]   ;;  %p829_p9 = scmp.eq.s32.totalorder %s412_s15, 1 }
  0x5f   : > { %v262_v9 = vunpack.c.l.bf16 %v261_v3  ;;  %v266_v10 = vunpack.c.l.bf16 %v265_v4  ;;  %v271_v11 = vunpack.c.l.bf16 %v270_v7  ;;  %v250_v35 = vshrl.u32 %v249_v30, 7  ;;  %s322_s20 = sshll.u32 %s664_s12, 4  ;;  %s323_s20 = int_to_ptr.vmem [resolvable:$true] %s322_s20 }
  0x60   : > { %v276_v13 = vunpack.c.l.bf16 %v275_v8  ;;  %vm303_vm3 = vcmp.eq.s32.totalorder %v259_v25, 3  ;;  %v252_v38 = vand.u32 127, %v249_v30  ;;  %s573_s6 = scalar_lea.vmem %s323_s20, 32  ;;  %p580_p2 = scmp.lt.s32.totalorder %s323_s20, %s323_s20 }
  0x61   : > { %v267_v12 = vmax.f32 %v262_v9, %v266_v10  ;;  %v256_v39 = vmul.u32 128, %v250_v35  ;;  %p574_p4 = scmp.ne.s32.totalorder %s323_s20, %s573_s6  ;;  %p581_p13 = scmp.lt.s32.totalorder %s573_s6, %s573_s6 }
  0x63   : > { %v272_v14 = vmax.f32 %v267_v12, %v271_v11  ;;  %v257_v42 = vadd.s32 %v256_v39, %v252_v38  ;;  %p575_p0 = pnand %p574_p4, %p829_p9  ;;  %p582_p3 = por %p581_p13, %p580_p2 }
  0x65   : > { %v277_v15 = vmax.f32 %v272_v14, %v276_v13  ;;  %vm258_vm4 = vcmp.lt.s32.totalorder %v257_v42, 256  ;;  %p576_p1 = pneg %p575_p0 }
  0x67   : > { %v278_v16 = vsub.f32 %v262_v9, %v277_v15  ;;  %v285_v17 = vsub.f32 %v266_v10, %v277_v15  ;;  %v292_v18 = vsub.f32 %v271_v11, %v277_v15  ;;  %v299_v19 = vsub.f32 %v276_v13, %v277_v15  ;;  %p583_p5 = pnand %p582_p3, %p576_p1 }
  0x69   : > { %v279_v20 = vmul.f32 1.442695, %v278_v16  ;;  %v286_v21 = vmul.f32 1.442695, %v285_v17  ;;  %v293_v22 = vmul.f32 1.442695, %v292_v18 }
  0x6a   : > { %v300_v23 = vmul.f32 1.442695, %v299_v19  ;;  %v283_v32 = vsel %vm282_vm0, %v278_v16, 0.0  ;;  %v290_v33 = vsel %vm289_vm1, %v285_v17, 0.0  ;;  %v297_v37 = vsel %vm296_vm2, %v292_v18, 0.0 }
  0x6b   : > { %503 = vpow2.f32 %v279_v20  ;;  %v291_v36 = vadd.f32 %v290_v33, %v283_v32  ;;  %v304_v41 = vsel %vm303_vm3, %v299_v19, 0.0 }
  0x6c   : > { %505 = vpow2.f32 %v286_v21 }
  0x6d   : > { %507 = vpow2.f32 %v293_v22  ;;  %v298_v40 = vadd.f32 %v297_v37, %v291_v36 }
  0x6e   : > { %509 = vpow2.f32 %v300_v23 }
  0x6f   : > { %v305_v43 = vadd.f32 %v304_v41, %v298_v40 }
  0x75   : > { %v504_v24 = vpop.eup %503 }
  0x76   : > { %v506_v26 = vpop.eup %505 }
  0x77   : > { %v508_v27 = vpop.eup %507  ;;  %v288_v28 = vadd.f32 %v506_v26, %v504_v24 }
  0x78   : > { %v510_v29 = vpop.eup %509 }
  0x79   : > { %v295_v31 = vadd.f32 %v508_v27, %v288_v28 }
  0x7b   : > { %v302_v34 = vadd.f32 %v510_v29, %v295_v31 }
  0x7d   : > { %511 = vlog2.f32 %v302_v34 }
  0x87   : > { %v512_v44 = vpop.eup %511 }
  0x88   : > { %v307_v45 = vmul.f32 0.6931472, %v512_v44 }
  0x8a   : > { %v308_v46 = vsub.f32 %v307_v45, %v305_v43 }
  0x8c   : > { %v310_v48 = vsel %vm258_vm4, %v308_v46, 0.0 }
  0x8d   : > { %v311_v49 = vadd.f32 %v310_v48, %v309_v47 }
  0x8f   : > { %312 = vst [vmem:[#allocation7] sm:$0x3] %v311_v49 }
  0x90   : > { %586 = shalt.err (!%p583_p5)
}
  0x91   : > { %s587_s15 = scalar_lea.hbm %s875_s2, 32 }
  0x92   : > { %p588_p6 = scmp.ne.s32.totalorder %s875_s2, %s587_s15  ;;  %p593_p8 = scmp.lt.u32.totalorder %s587_s15, %s875_s2 }
  0x94   : > { %p589_p10 = pnand %p588_p6, %p829_p9 }
  0x96   : > { %p590_p12 = pneg %p589_p10 }
  0x98   : > { %p595_p11 = pnand %p593_p8, %p590_p12 }
  0x9a   : > { %598 = shalt.err (!%p595_p11)
}
  0x9b   : > { %438 = dma.vmem_to_hbm [thread:$0]  (%p829_p9), %s323_s20, 32, %s875_s2, [#allocation4]  }
  0x9c   : > { %632 = dma.done.wait (%p829_p9), [#allocation4], 32  }
  0x9d   : > { %634 = vsyncadd (%p829_p9), [#allocation4], 4294967264 }
  0x9e PF: > { %s19_s14 = sadd.s32 1, %s657_s14   ;;  %s884_s9 = smov %s641_s10 }
  0x9f   : > { %p16_p7 = scmp.ge.s32.totalorder %s19_s14, 4   ;;  %s885_s10 = smov %s645_s11 }
  0xa0   : > { %s886_s11 = smov %s731_s21  ;;  %s887_s12 = smov %s653_s13 }
  0xa1   : > { %s888_s13 = smov %s890_s16  ;;  %18 = sbr.rel (!%p16_p7) target bundleno = 7 (0x7), region = 86 }
  0xa8   :  { %335 = vsyncpa [#allocation3], 1 }
  0xa9   :  { %337 = vsyncpa [#allocation3 + $0x1], 1 }
  0xaa   :  { %338 = vsyncpa [#allocation6], 1 }
  0xab   :  { %340 = vsyncpa [#allocation6 + $0x1], 1 }
  0xac   :  { %341 = vsyncpa [#allocation4], 1 }
  0xad   :  { %343 = vsyncpa [#allocation4 + $0x1], 1 }

</bundles_post_ra>
